<compile_context>
chip_gen: v7x
topology: tpu7x:2x2x1
jax: 0.10.0
libtpu: 0.0.40
codegen_flags: <defaults>
</compile_context>

<pallas_src>
import jax
import jax.numpy as jnp
from jax import lax
from jax.experimental import pallas as pl
from jax.experimental.pallas import tpu as pltpu

LANE = 128
MAX_TILE_R = 2048        # sublane rows per grid step (2 MiB f32 logits block)
NUM_STATS = 5            # [inter, pred1_cnt, cnt1, sum_nll_total, sum_nll1]


def _make_kernel(tile_r, hw, num_t_inner, needs_mask):
    """Stats kernel specialized on tile size / split factor / tail masking."""
    rows8 = tile_r // 8          # tile_r is guaranteed a multiple of 8

    def tile_sum(f):
        # Reduce over the leading (non-layout) axis: pure VPU vreg adds, no XLU.
        return jnp.sum(f.reshape(rows8, 8, LANE), axis=0)

    def kernel(cls_ref, lab_ref, out_ref):
        p = pl.program_id(1)                     # row-tile half (v7x split)
        t = pl.program_id(2)                     # row-tile within the half

        l0 = cls_ref[0, 0].astype(jnp.float32)   # (tile_r, 128) logits class 0
        l1 = cls_ref[0, 1].astype(jnp.float32)   # (tile_r, 128) logits class 1
        lab = lab_ref[0]                         # (tile_r, 128) int labels

        diff = l1 - l0                           # > 0  <=>  softmax prob1 > prob0
        pred1 = diff > 0                         # strict >, matches reference ties
        is1 = lab == 1

        if needs_mask:
            # Mask pixels whose flat index within this plane >= H*W (covers lane
            # padding and out-of-bounds rows of partial boundary blocks).
            row = lax.broadcasted_iota(jnp.int32, (tile_r, LANE), 0)
            lane = lax.broadcasted_iota(jnp.int32, (tile_r, LANE), 1)
            g = p * num_t_inner + t
            flat = g * (tile_r * LANE) + row * LANE + lane
            valid = flat < hw
            pred1 = jnp.logical_and(valid, pred1)
            is1 = jnp.logical_and(valid, is1)

        inter = jnp.logical_and(is1, pred1)      # lab & matrix

        # Per-pixel 2-class NLL as one stable softplus of the signed logit gap:
        #   label==0 -> softplus(diff),  label==1 -> softplus(-diff)
        # softplus(x) = relu(x) + log(1 + exp(-|x|)); |x| == |diff| either way,
        # and relu(-diff) = relu(diff) - diff gives a select-free per-label relu.
        ad = jnp.abs(diff)
        log_term = jnp.log(1.0 + jnp.exp(-ad))
        is1_f = is1.astype(jnp.float32)
        nll = log_term + jnp.maximum(diff, 0.0) - is1_f * diff
        if needs_mask:
            nll = jnp.where(valid, nll, 0.0)     # drop garbage/padded pixels
        nll1 = is1_f * nll                       # is1 already implies valid

        partials = (
            tile_sum(inter.astype(jnp.float32)),  # intersection count
            tile_sum(pred1.astype(jnp.float32)),  # predicted-1 count
            tile_sum(is1_f),                      # label-1 count
            tile_sum(nll),                        # total CE numerator
            tile_sum(nll1),                       # CE numerator, class 1
        )

        # Accumulate into the resident output block (stays in VMEM across t).
        @pl.when(t == 0)
        def _():
            for k in range(NUM_STATS):
                out_ref[0, 0, k] = partials[k]

        @pl.when(t > 0)
        def _():
            for k in range(NUM_STATS):
                out_ref[0, 0, k] += partials[k]

    return kernel


def iou_loss(cls_score, label, *, loss_weight=1.0, lambda_iou=1.0,
             alpha0=1.0, alpha1=1.0):
    """Pallas implementation of IoULoss.forward (reduction='mean')."""
    N, C, H, W = cls_score.shape
    assert C == 2, "IoULoss is a binary-segmentation loss (C == 2)."
    HW = H * W
    P = N * HW

    # Keep the flattened plane a multiple of 8*128 so row tiles are sublane-exact.
    GRAIN = 8 * LANE
    HWp = ((HW + GRAIN - 1) // GRAIN) * GRAIN
    R = HWp // LANE
    if HWp == HW:
        cls4 = cls_score.reshape(N, 2, R, LANE)          # free contiguous reshape
        lab3 = label.reshape(N, R, LANE)
    else:
        # TODO(synk): non-1024-multiple planes take one pad copy here; pad W
        # upstream (and cache the layout) to keep the hot path zero-copy.
        padl = HWp - HW
        cls4 = jnp.pad(cls_score.reshape(N, 2, HW),
                       ((0, 0), (0, 0), (0, padl))).reshape(N, 2, R, LANE)
        lab3 = jnp.pad(label.reshape(N, HW),
                       ((0, 0), (0, padl))).reshape(N, R, LANE)

    # Tile selection: biggest lane-dense tile that fits comfortably in VMEM.
    tile_r = min(R, MAX_TILE_R)
    num_t_total = pl.cdiv(R, tile_r)
    if N == 1 and num_t_total == 1 and R >= 16:
        # Single-image call: shrink the tile so the plane splits into two halves
        # and v7x's second TensorCore gets work (batch axis alone would idle it).
        tile_r = ((R // 2 + 7) // 8) * 8
        num_t_total = pl.cdiv(R, tile_r)
    if N == 1 and num_t_total % 2 == 0:
        num_par, num_t_inner = 2, num_t_total // 2
    else:
        num_par, num_t_inner = 1, num_t_total

    needs_mask = (HWp != HW) or (num_par * num_t_inner * tile_r != R)

    kernel = _make_kernel(tile_r, HW, num_t_inner, needs_mask)

    out = pl.pallas_call(
        kernel,
        out_shape=jax.ShapeDtypeStruct((N, num_par, NUM_STATS, 8, LANE),
                                       jnp.float32),
        grid_spec=pltpu.PrefetchScalarGridSpec(
            num_scalar_prefetch=0,
            grid=(N, num_par, num_t_inner),
            in_specs=[
                # fused (class0, class1) logit planes of batch n
                pl.BlockSpec((1, 2, tile_r, LANE),
                             lambda n, p, t: (n, 0, p * num_t_inner + t, 0)),
                pl.BlockSpec((1, tile_r, LANE),
                             lambda n, p, t: (n, p * num_t_inner + t, 0)),
            ],
            out_specs=pl.BlockSpec((1, 1, NUM_STATS, 8, LANE),
                                   lambda n, p, t: (n, p, 0, 0, 0)),
        ),
        compiler_params=pltpu.CompilerParams(
            dimension_semantics=("parallel", "parallel", "arbitrary")),
    )(cls4, lab3)

    # Tiny wrapper-side reduction (N * num_par * 20 KiB) + scalar glue
    # (mirrors the .item()/math.exp logic of the PyTorch module).
    stats = jnp.sum(out, axis=(0, 1, 3, 4))          # (NUM_STATS,)
    s_i, s_p1, cnt1 = stats[0], stats[1], stats[2]
    sum_nll_tot, sum_nll1 = stats[3], stats[4]
    sum_nll0 = sum_nll_tot - sum_nll1

    s_u = cnt1 + s_p1 - s_i                 # |label==1  OR  pred==1|
    cnt0 = jnp.float32(P) - cnt1            # labels assumed binary {0,1}
    iou = s_i / jnp.maximum(s_u, 1.0)       # guard 0/0 (reference would div-by-zero)
    beta = jnp.exp((1.0 - iou) * jnp.float32(lambda_iou))
    w0 = jnp.float32(alpha0)
    w1 = beta * jnp.float32(alpha1)

    # F.cross_entropy(weight=class_weight) + weight_reduce_loss with
    # avg_factor = sum(class_weight[label])  ==>  weighted mean:
    loss = (w0 * sum_nll0 + w1 * sum_nll1) / (w0 * cnt0 + w1 * cnt1)
    return jnp.float32(loss_weight) * loss
    # TODO(synk): ignore_index / avg_non_ignore and labels outside {0,1} are not
    # handled (the reference with class_weight would index class_weight[-100] and
    # crash); reduction_override != 'mean' is also not implemented.
    # TODO(synk): counts accumulate in f32 (exact to 2^24 per lane cell); for
    # extreme N*H*W, switch the three count planes to int accumulation.


def _reference_loss(cls_score, label, *, loss_weight=1.0, lambda_iou=1.0,
                    alpha0=1.0, alpha1=1.0):
    """Pure-JAX mirror of the PyTorch forward, for validation."""
    prob = jax.nn.softmax(cls_score, axis=1)
    matrix = (prob[:, 1] > prob[:, 0]).astype(jnp.int32)
    lab = label.astype(jnp.int32)
    i = jnp.sum(lab & matrix).astype(jnp.float32)
    u = jnp.sum(lab | matrix).astype(jnp.float32)
    beta = jnp.exp((1.0 - i / u) * lambda_iou)
    w = jnp.array([alpha0, beta * alpha1], dtype=jnp.float32)
    logp = jax.nn.log_softmax(cls_score, axis=1)
    nll = -jnp.take_along_axis(logp, label[:, None, :, :], axis=1)[:, 0]
    wl = w[label]
    return jnp.float32(loss_weight) * jnp.sum(wl * nll) / jnp.sum(wl)


if __name__ == "__main__":
    key = jax.random.PRNGKey(0)

    # Case 1: padded/masked path (HW not a multiple of 1024), batch-parallel.
    k1, k2, key = jax.random.split(key, 3)
    N, C, H, W = 2, 2, 16, 16
    cls_score = jax.random.normal(k1, (N, C, H, W), dtype=jnp.float32)
    label = jax.random.randint(k2, (N, H, W), 0, 2, dtype=jnp.int32)
    out = jax.block_until_ready(iou_loss(cls_score, label))
    ref = _reference_loss(cls_score, label)
    assert jnp.allclose(out, ref, rtol=1e-4, atol=1e-5), (out, ref)

    # Case 2: zero-copy unmasked path (HW multiple of 1024).
    k1, k2, key = jax.random.split(key, 3)
    N, H, W = 1, 32, 32
    cls_score = jax.random.normal(k1, (N, C, H, W), dtype=jnp.float32)
    label = jax.random.randint(k2, (N, H, W), 0, 2, dtype=jnp.int32)
    out = jax.block_until_ready(iou_loss(cls_score, label, lambda_iou=2.0,
                                         alpha0=0.5, alpha1=1.5))
    ref = _reference_loss(cls_score, label, lambda_iou=2.0,
                          alpha0=0.5, alpha1=1.5)
    assert jnp.allclose(out, ref, rtol=1e-4, atol=1e-5), (out, ref)

    # Case 3: N == 1 with the two-way row-tile split (dual-core grid axis).
    k1, k2, key = jax.random.split(key, 3)
    N, H, W = 1, 64, 64
    cls_score = jax.random.normal(k1, (N, C, H, W), dtype=jnp.float32)
    label = jax.random.randint(k2, (N, H, W), 0, 2, dtype=jnp.int32)
    out = jax.block_until_ready(iou_loss(cls_score, label))
    ref = _reference_loss(cls_score, label)
    assert jnp.allclose(out, ref, rtol=1e-4, atol=1e-5), (out, ref)

    print("KERNEL_OK")
</pallas_src>

<mosaic_0001>
module attributes {stable_mosaic.version = 11 : i64} {
  func.func @kernel(%arg0: i32, %arg1: i32, %arg2: i32, %arg3: memref<1x2x8x128xf32, #tpu.memory_space<vmem>>, %arg4: memref<1x8x128xi32, #tpu.memory_space<vmem>>, %arg5: memref<1x1x5x8x128xf32, #tpu.memory_space<vmem>>) attributes {dimension_semantics = [#tpu.dimension_semantics<parallel>, #tpu.dimension_semantics<parallel>, #tpu.dimension_semantics<arbitrary>], iteration_bounds = array<i64: 2, 1, 1>, scalar_prefetch = 0 : i64, scratch_operands = 0 : i64, tpu.core_type = #tpu.core_type<tc>, window_params = [{transform_indices = @transform_0, window_bounds = array<i64: 1, 2, 8, 128>}, {transform_indices = @transform_1, window_bounds = array<i64: 1, 8, 128>}, {transform_indices = @transform_2, window_bounds = array<i64: 1, 1, 5, 8, 128>}]} {
    %c0 = arith.constant 0 : index
    %c0_0 = arith.constant 0 : index
    %c0_1 = arith.constant 0 : index
    %c0_2 = arith.constant 0 : index
    %0 = vector.load %arg3[%c0, %c0_0, %c0_1, %c0_2] : memref<1x2x8x128xf32, #tpu.memory_space<vmem>>, vector<1x1x8x128xf32>
    %1 = vector.shape_cast %0 : vector<1x1x8x128xf32> to vector<8x128xf32>
    %c0_3 = arith.constant 0 : index
    %c1 = arith.constant 1 : index
    %c0_4 = arith.constant 0 : index
    %c0_5 = arith.constant 0 : index
    %2 = vector.load %arg3[%c0_3, %c1, %c0_4, %c0_5] : memref<1x2x8x128xf32, #tpu.memory_space<vmem>>, vector<1x1x8x128xf32>
    %3 = vector.shape_cast %2 : vector<1x1x8x128xf32> to vector<8x128xf32>
    %c0_6 = arith.constant 0 : index
    %c0_7 = arith.constant 0 : index
    %c0_8 = arith.constant 0 : index
    %4 = vector.load %arg4[%c0_6, %c0_7, %c0_8] : memref<1x8x128xi32, #tpu.memory_space<vmem>>, vector<1x8x128xi32>
    %5 = vector.shape_cast %4 : vector<1x8x128xi32> to vector<8x128xi32>
    %6 = arith.subf %3, %1 : vector<8x128xf32>
    %cst = arith.constant 0.000000e+00 : f32
    %7 = vector.broadcast %cst : f32 to vector<8x128xf32>
    %8 = arith.cmpf ogt, %6, %7 : vector<8x128xf32>
    %c1_i32 = arith.constant 1 : i32
    %9 = vector.broadcast %c1_i32 : i32 to vector<8x128xi32>
    %10 = arith.cmpi eq, %5, %9 : vector<8x128xi32>
    %11 = tpu.iota {dimensions = array<i32: 0>} : vector<8x128xi32>
    %12 = tpu.iota {dimensions = array<i32: 1>} : vector<8x128xi32>
    %c1_i32_9 = arith.constant 1 : i32
    %13 = arith.muli %arg1, %c1_i32_9 : i32
    %14 = arith.addi %13, %arg2 : i32
    %c1024_i32 = arith.constant 1024 : i32
    %15 = arith.muli %14, %c1024_i32 : i32
    %c128_i32 = arith.constant 128 : i32
    %16 = vector.broadcast %c128_i32 : i32 to vector<8x128xi32>
    %17 = arith.muli %11, %16 : vector<8x128xi32>
    %18 = vector.broadcast %15 : i32 to vector<8x128xi32>
    %19 = arith.addi %18, %17 : vector<8x128xi32>
    %20 = arith.addi %19, %12 : vector<8x128xi32>
    %c256_i32 = arith.constant 256 : i32
    %21 = vector.broadcast %c256_i32 : i32 to vector<8x128xi32>
    %22 = arith.cmpi slt, %20, %21 : vector<8x128xi32>
    %23 = arith.andi %22, %8 : vector<8x128xi1>
    %24 = arith.andi %22, %10 : vector<8x128xi1>
    %25 = arith.andi %24, %23 : vector<8x128xi1>
    %26 = math.absf %6 : vector<8x128xf32>
    %cst_10 = arith.constant 0.000000e+00 : f32
    %27 = vector.broadcast %cst_10 : f32 to vector<8x128xf32>
    %28 = arith.subf %27, %26 : vector<8x128xf32>
    %29 = math.exp %28 : vector<8x128xf32>
    %cst_11 = arith.constant 1.000000e+00 : f32
    %30 = vector.broadcast %cst_11 : f32 to vector<8x128xf32>
    %31 = arith.addf %30, %29 : vector<8x128xf32>
    %32 = math.log %31 : vector<8x128xf32>
    %33 = arith.extui %24 : vector<8x128xi1> to vector<8x128xi32>
    %34 = arith.sitofp %33 : vector<8x128xi32> to vector<8x128xf32>
    %cst_12 = arith.constant 0.000000e+00 : f32
    %35 = vector.broadcast %cst_12 : f32 to vector<8x128xf32>
    %36 = arith.maximumf %6, %35 : vector<8x128xf32>
    %37 = arith.addf %32, %36 : vector<8x128xf32>
    %38 = arith.mulf %34, %6 : vector<8x128xf32>
    %39 = arith.subf %37, %38 : vector<8x128xf32>
    %cst_13 = arith.constant 0.000000e+00 : f32
    %40 = vector.broadcast %cst_13 : f32 to vector<8x128xf32>
    %41 = arith.select %22, %39, %40 : vector<8x128xi1>, vector<8x128xf32>
    %42 = arith.mulf %34, %41 : vector<8x128xf32>
    %43 = arith.extui %25 : vector<8x128xi1> to vector<8x128xi32>
    %44 = arith.sitofp %43 : vector<8x128xi32> to vector<8x128xf32>
    %45 = vector.shape_cast %44 : vector<8x128xf32> to vector<1x8x128xf32>
    %cst_14 = arith.constant dense<0.000000e+00> : vector<8x128xf32>
    %46 = vector.multi_reduction <add>, %45, %cst_14 [0] : vector<1x8x128xf32> to vector<8x128xf32>
    %47 = arith.extui %23 : vector<8x128xi1> to vector<8x128xi32>
    %48 = arith.sitofp %47 : vector<8x128xi32> to vector<8x128xf32>
    %49 = vector.shape_cast %48 : vector<8x128xf32> to vector<1x8x128xf32>
    %cst_15 = arith.constant dense<0.000000e+00> : vector<8x128xf32>
    %50 = vector.multi_reduction <add>, %49, %cst_15 [0] : vector<1x8x128xf32> to vector<8x128xf32>
    %51 = vector.shape_cast %34 : vector<8x128xf32> to vector<1x8x128xf32>
    %cst_16 = arith.constant dense<0.000000e+00> : vector<8x128xf32>
    %52 = vector.multi_reduction <add>, %51, %cst_16 [0] : vector<1x8x128xf32> to vector<8x128xf32>
    %53 = vector.shape_cast %41 : vector<8x128xf32> to vector<1x8x128xf32>
    %cst_17 = arith.constant dense<0.000000e+00> : vector<8x128xf32>
    %54 = vector.multi_reduction <add>, %53, %cst_17 [0] : vector<1x8x128xf32> to vector<8x128xf32>
    %55 = vector.shape_cast %42 : vector<8x128xf32> to vector<1x8x128xf32>
    %cst_18 = arith.constant dense<0.000000e+00> : vector<8x128xf32>
    %56 = vector.multi_reduction <add>, %55, %cst_18 [0] : vector<1x8x128xf32> to vector<8x128xf32>
    %c0_i32 = arith.constant 0 : i32
    %57 = arith.cmpi eq, %arg2, %c0_i32 : i32
    %58 = arith.extui %57 : i1 to i32
    %c0_i32_19 = arith.constant 0 : i32
    %59 = arith.cmpi ne, %58, %c0_i32_19 : i32
    scf.if %59 {
      %c0_22 = arith.constant 0 : index
      %c0_23 = arith.constant 0 : index
      %c0_24 = arith.constant 0 : index
      %c0_25 = arith.constant 0 : index
      %c0_26 = arith.constant 0 : index
      %63 = vector.load %arg5[%c0_22, %c0_23, %c0_24, %c0_25, %c0_26] : memref<1x1x5x8x128xf32, #tpu.memory_space<vmem>>, vector<1x1x1x8x128xf32>
      %64 = vector.shape_cast %63 : vector<1x1x1x8x128xf32> to vector<8x128xf32>
      %65 = vector.shape_cast %46 : vector<8x128xf32> to vector<1x1x1x8x128xf32>
      tpu.vector_store %arg5[%c0_22, %c0_23, %c0_24, %c0_25, %c0_26], %65 {strides = array<i32>} : memref<1x1x5x8x128xf32, #tpu.memory_space<vmem>>, vector<1x1x1x8x128xf32>,
      %c0_27 = arith.constant 0 : index
      %c0_28 = arith.constant 0 : index
      %c1_29 = arith.constant 1 : index
      %c0_30 = arith.constant 0 : index
      %c0_31 = arith.constant 0 : index
      %66 = vector.load %arg5[%c0_27, %c0_28, %c1_29, %c0_30, %c0_31] : memref<1x1x5x8x128xf32, #tpu.memory_space<vmem>>, vector<1x1x1x8x128xf32>
      %67 = vector.shape_cast %66 : vector<1x1x1x8x128xf32> to vector<8x128xf32>
      %68 = vector.shape_cast %50 : vector<8x128xf32> to vector<1x1x1x8x128xf32>
      tpu.vector_store %arg5[%c0_27, %c0_28, %c1_29, %c0_30, %c0_31], %68 {strides = array<i32>} : memref<1x1x5x8x128xf32, #tpu.memory_space<vmem>>, vector<1x1x1x8x128xf32>,
      %c0_32 = arith.constant 0 : index
      %c0_33 = arith.constant 0 : index
      %c2 = arith.constant 2 : index
      %c0_34 = arith.constant 0 : index
      %c0_35 = arith.constant 0 : index
      %69 = vector.load %arg5[%c0_32, %c0_33, %c2, %c0_34, %c0_35] : memref<1x1x5x8x128xf32, #tpu.memory_space<vmem>>, vector<1x1x1x8x128xf32>
      %70 = vector.shape_cast %69 : vector<1x1x1x8x128xf32> to vector<8x128xf32>
      %71 = vector.shape_cast %52 : vector<8x128xf32> to vector<1x1x1x8x128xf32>
      tpu.vector_store %arg5[%c0_32, %c0_33, %c2, %c0_34, %c0_35], %71 {strides = array<i32>} : memref<1x1x5x8x128xf32, #tpu.memory_space<vmem>>, vector<1x1x1x8x128xf32>,
      %c0_36 = arith.constant 0 : index
      %c0_37 = arith.constant 0 : index
      %c3 = arith.constant 3 : index
      %c0_38 = arith.constant 0 : index
      %c0_39 = arith.constant 0 : index
      %72 = vector.load %arg5[%c0_36, %c0_37, %c3, %c0_38, %c0_39] : memref<1x1x5x8x128xf32, #tpu.memory_space<vmem>>, vector<1x1x1x8x128xf32>
      %73 = vector.shape_cast %72 : vector<1x1x1x8x128xf32> to vector<8x128xf32>
      %74 = vector.shape_cast %54 : vector<8x128xf32> to vector<1x1x1x8x128xf32>
      tpu.vector_store %arg5[%c0_36, %c0_37, %c3, %c0_38, %c0_39], %74 {strides = array<i32>} : memref<1x1x5x8x128xf32, #tpu.memory_space<vmem>>, vector<1x1x1x8x128xf32>,
      %c0_40 = arith.constant 0 : index
      %c0_41 = arith.constant 0 : index
      %c4 = arith.constant 4 : index
      %c0_42 = arith.constant 0 : index
      %c0_43 = arith.constant 0 : index
      %75 = vector.load %arg5[%c0_40, %c0_41, %c4, %c0_42, %c0_43] : memref<1x1x5x8x128xf32, #tpu.memory_space<vmem>>, vector<1x1x1x8x128xf32>
      %76 = vector.shape_cast %75 : vector<1x1x1x8x128xf32> to vector<8x128xf32>
      %77 = vector.shape_cast %56 : vector<8x128xf32> to vector<1x1x1x8x128xf32>
      tpu.vector_store %arg5[%c0_40, %c0_41, %c4, %c0_42, %c0_43], %77 {strides = array<i32>} : memref<1x1x5x8x128xf32, #tpu.memory_space<vmem>>, vector<1x1x1x8x128xf32>,
    } else {
    }
    %c0_i32_20 = arith.constant 0 : i32
    %60 = arith.cmpi sgt, %arg2, %c0_i32_20 : i32
    %61 = arith.extui %60 : i1 to i32
    %c0_i32_21 = arith.constant 0 : i32
    %62 = arith.cmpi ne, %61, %c0_i32_21 : i32
    scf.if %62 {
      %c0_22 = arith.constant 0 : index
      %c0_23 = arith.constant 0 : index
      %c0_24 = arith.constant 0 : index
      %c0_25 = arith.constant 0 : index
      %c0_26 = arith.constant 0 : index
      %63 = vector.load %arg5[%c0_22, %c0_23, %c0_24, %c0_25, %c0_26] : memref<1x1x5x8x128xf32, #tpu.memory_space<vmem>>, vector<1x1x1x8x128xf32>
      %64 = vector.shape_cast %63 : vector<1x1x1x8x128xf32> to vector<8x128xf32>
      %65 = arith.addf %64, %46 : vector<8x128xf32>
      %c0_27 = arith.constant 0 : index
      %c0_28 = arith.constant 0 : index
      %c0_29 = arith.constant 0 : index
      %c0_30 = arith.constant 0 : index
      %c0_31 = arith.constant 0 : index
      %66 = vector.load %arg5[%c0_27, %c0_28, %c0_29, %c0_30, %c0_31] : memref<1x1x5x8x128xf32, #tpu.memory_space<vmem>>, vector<1x1x1x8x128xf32>
      %67 = vector.shape_cast %66 : vector<1x1x1x8x128xf32> to vector<8x128xf32>
      %68 = vector.shape_cast %65 : vector<8x128xf32> to vector<1x1x1x8x128xf32>
      tpu.vector_store %arg5[%c0_27, %c0_28, %c0_29, %c0_30, %c0_31], %68 {strides = array<i32>} : memref<1x1x5x8x128xf32, #tpu.memory_space<vmem>>, vector<1x1x1x8x128xf32>,
      %c0_32 = arith.constant 0 : index
      %c0_33 = arith.constant 0 : index
      %c1_34 = arith.constant 1 : index
      %c0_35 = arith.constant 0 : index
      %c0_36 = arith.constant 0 : index
      %69 = vector.load %arg5[%c0_32, %c0_33, %c1_34, %c0_35, %c0_36] : memref<1x1x5x8x128xf32, #tpu.memory_space<vmem>>, vector<1x1x1x8x128xf32>
      %70 = vector.shape_cast %69 : vector<1x1x1x8x128xf32> to vector<8x128xf32>
      %71 = arith.addf %70, %50 : vector<8x128xf32>
      %c0_37 = arith.constant 0 : index
      %c0_38 = arith.constant 0 : index
      %c1_39 = arith.constant 1 : index
      %c0_40 = arith.constant 0 : index
      %c0_41 = arith.constant 0 : index
      %72 = vector.load %arg5[%c0_37, %c0_38, %c1_39, %c0_40, %c0_41] : memref<1x1x5x8x128xf32, #tpu.memory_space<vmem>>, vector<1x1x1x8x128xf32>
      %73 = vector.shape_cast %72 : vector<1x1x1x8x128xf32> to vector<8x128xf32>
      %74 = vector.shape_cast %71 : vector<8x128xf32> to vector<1x1x1x8x128xf32>
      tpu.vector_store %arg5[%c0_37, %c0_38, %c1_39, %c0_40, %c0_41], %74 {strides = array<i32>} : memref<1x1x5x8x128xf32, #tpu.memory_space<vmem>>, vector<1x1x1x8x128xf32>,
      %c0_42 = arith.constant 0 : index
      %c0_43 = arith.constant 0 : index
      %c2 = arith.constant 2 : index
      %c0_44 = arith.constant 0 : index
      %c0_45 = arith.constant 0 : index
      %75 = vector.load %arg5[%c0_42, %c0_43, %c2, %c0_44, %c0_45] : memref<1x1x5x8x128xf32, #tpu.memory_space<vmem>>, vector<1x1x1x8x128xf32>
      %76 = vector.shape_cast %75 : vector<1x1x1x8x128xf32> to vector<8x128xf32>
      %77 = arith.addf %76, %52 : vector<8x128xf32>
      %c0_46 = arith.constant 0 : index
      %c0_47 = arith.constant 0 : index
      %c2_48 = arith.constant 2 : index
      %c0_49 = arith.constant 0 : index
      %c0_50 = arith.constant 0 : index
      %78 = vector.load %arg5[%c0_46, %c0_47, %c2_48, %c0_49, %c0_50] : memref<1x1x5x8x128xf32, #tpu.memory_space<vmem>>, vector<1x1x1x8x128xf32>
      %79 = vector.shape_cast %78 : vector<1x1x1x8x128xf32> to vector<8x128xf32>
      %80 = vector.shape_cast %77 : vector<8x128xf32> to vector<1x1x1x8x128xf32>
      tpu.vector_store %arg5[%c0_46, %c0_47, %c2_48, %c0_49, %c0_50], %80 {strides = array<i32>} : memref<1x1x5x8x128xf32, #tpu.memory_space<vmem>>, vector<1x1x1x8x128xf32>,
      %c0_51 = arith.constant 0 : index
      %c0_52 = arith.constant 0 : index
      %c3 = arith.constant 3 : index
      %c0_53 = arith.constant 0 : index
      %c0_54 = arith.constant 0 : index
      %81 = vector.load %arg5[%c0_51, %c0_52, %c3, %c0_53, %c0_54] : memref<1x1x5x8x128xf32, #tpu.memory_space<vmem>>, vector<1x1x1x8x128xf32>
      %82 = vector.shape_cast %81 : vector<1x1x1x8x128xf32> to vector<8x128xf32>
      %83 = arith.addf %82, %54 : vector<8x128xf32>
      %c0_55 = arith.constant 0 : index
      %c0_56 = arith.constant 0 : index
      %c3_57 = arith.constant 3 : index
      %c0_58 = arith.constant 0 : index
      %c0_59 = arith.constant 0 : index
      %84 = vector.load %arg5[%c0_55, %c0_56, %c3_57, %c0_58, %c0_59] : memref<1x1x5x8x128xf32, #tpu.memory_space<vmem>>, vector<1x1x1x8x128xf32>
      %85 = vector.shape_cast %84 : vector<1x1x1x8x128xf32> to vector<8x128xf32>
      %86 = vector.shape_cast %83 : vector<8x128xf32> to vector<1x1x1x8x128xf32>
      tpu.vector_store %arg5[%c0_55, %c0_56, %c3_57, %c0_58, %c0_59], %86 {strides = array<i32>} : memref<1x1x5x8x128xf32, #tpu.memory_space<vmem>>, vector<1x1x1x8x128xf32>,
      %c0_60 = arith.constant 0 : index
      %c0_61 = arith.constant 0 : index
      %c4 = arith.constant 4 : index
      %c0_62 = arith.constant 0 : index
      %c0_63 = arith.constant 0 : index
      %87 = vector.load %arg5[%c0_60, %c0_61, %c4, %c0_62, %c0_63] : memref<1x1x5x8x128xf32, #tpu.memory_space<vmem>>, vector<1x1x1x8x128xf32>
      %88 = vector.shape_cast %87 : vector<1x1x1x8x128xf32> to vector<8x128xf32>
      %89 = arith.addf %88, %56 : vector<8x128xf32>
      %c0_64 = arith.constant 0 : index
      %c0_65 = arith.constant 0 : index
      %c4_66 = arith.constant 4 : index
      %c0_67 = arith.constant 0 : index
      %c0_68 = arith.constant 0 : index
      %90 = vector.load %arg5[%c0_64, %c0_65, %c4_66, %c0_67, %c0_68] : memref<1x1x5x8x128xf32, #tpu.memory_space<vmem>>, vector<1x1x1x8x128xf32>
      %91 = vector.shape_cast %90 : vector<1x1x1x8x128xf32> to vector<8x128xf32>
      %92 = vector.shape_cast %89 : vector<8x128xf32> to vector<1x1x1x8x128xf32>
      tpu.vector_store %arg5[%c0_64, %c0_65, %c4_66, %c0_67, %c0_68], %92 {strides = array<i32>} : memref<1x1x5x8x128xf32, #tpu.memory_space<vmem>>, vector<1x1x1x8x128xf32>,
    } else {
    }
    return
  }
  func.func @transform_0(%arg0: i32, %arg1: i32, %arg2: i32) -> (i32, i32, i32, i32) {
    %c1_i32 = arith.constant 1 : i32
    %0 = arith.muli %arg1, %c1_i32 : i32
    %1 = arith.addi %0, %arg2 : i32
    %c0_i32 = arith.constant 0 : i32
    %c0_i32_0 = arith.constant 0 : i32
    %c0_i32_1 = arith.constant 0 : i32
    return %arg0, %c0_i32, %1, %c0_i32_0 : i32, i32, i32, i32
  }
  func.func @transform_1(%arg0: i32, %arg1: i32, %arg2: i32) -> (i32, i32, i32) {
    %c1_i32 = arith.constant 1 : i32
    %0 = arith.muli %arg1, %c1_i32 : i32
    %1 = arith.addi %0, %arg2 : i32
    %c0_i32 = arith.constant 0 : i32
    %c0_i32_0 = arith.constant 0 : i32
    return %arg0, %1, %c0_i32 : i32, i32, i32
  }
  func.func @transform_2(%arg0: i32, %arg1: i32, %arg2: i32) -> (i32, i32, i32, i32, i32) {
    %c0_i32 = arith.constant 0 : i32
    %c0_i32_0 = arith.constant 0 : i32
    %c0_i32_1 = arith.constant 0 : i32
    %c0_i32_2 = arith.constant 0 : i32
    return %arg0, %arg1, %c0_i32, %c0_i32_0, %c0_i32_1 : i32, i32, i32, i32, i32
  }
}

</mosaic_0001>

<bundles_post_ra>
// kernel: tpu_custom_call.1
= control target key start
LH: loop header
LB: loop body
LE: loop exit
PB: predicated region body
PF: predicated region fallthrough
CT: control target
= control target key end

     0   :  { %7 = vsyncpa [#allocation3], 0  ;;  %s948_s0 = inlined_call_operand.hbm [shape: f32[2,2,8,128], index: 0, kind: input, shape index: {}]   ;;  %s949_s1 = inlined_call_operand.hbm [shape: s32[2,8,128], index: 1, kind: input, shape index: {}]   ;;  %s950_s2 = inlined_call_operand.hbm [shape: f32[2,1,5,8,128], index: 2, kind: output, shape index: {}]  }
   0x1   :  { %9 = vsyncpa [#allocation3 + $0x1], 0 }
   0x2   :  { %10 = vsyncpa [#allocation6], 0 }
   0x3   :  { %12 = vsyncpa [#allocation6 + $0x1], 0 }
   0x4   :  { %13 = vsyncpa [#allocation4], 0 }
   0x5   :  { %15 = vsyncpa [#allocation4 + $0x1], 0  ;;  %s727_s9 = smov 0   ;;  %s729_s10 = smov 0  }
   0x6   :  { %s731_s11 = smov 0   ;;  %s733_s12 = smov 0  }
   0x7   :  { %s735_s13 = smov 0   ;;  %s737_s14 = smov 0  }
   0x8 LB: > { %s446_s15 = sadd.s32 4294967295, %s702_s14   ;;  %s447_s16 = sadd.s32 4294967294, %s702_s14   ;;  %s702_s14 = sphi %s737_s14, %s21_s14   ;;  %s698_s13 = sphi %s735_s13, %s969_s13   ;;  %s694_s12 = sphi %s733_s12, %s968_s12   ;;  %s690_s11 = sphi %s731_s11, %s967_s11   ;;  %s686_s10 = sphi %s729_s10, %s966_s10   ;;  %s682_s9 = sphi %s727_s9, %s965_s9  }
   0x9   : > { %s40_s17 = sadd.s32 1, %s698_s13  ;;  %s51_s18 = sadd.s32 1, %s690_s11 }
   0xa   : > { %p42_p0 = scmp.ge.s32.totalorder %s40_s17, 2  ;;  %p58_p1 = scmp.ne.s32.totalorder %s690_s11, %s686_s10 }
   0xb   : > { %p59_p2 = scmp.eq.s32.totalorder %s702_s14, 0  ;;  %p64_p3 = scmp.ne.s32.totalorder %s686_s10, %s682_s9 }
   0xc   : > { %s971_s17 = smov (%p42_p0, %s40_s17), 0  ;;  %p65_p5 = scmp.eq.s32.totalorder %s446_s15, 0 }
   0xd   : > { %p768_p4 = por %p59_p2, %p58_p1  ;;  %s46_s20 = ssub.s32 %s698_s13, %s971_s17 }
   0xe   : > { %p120_p6 = scmp.eq.s32.totalorder %s446_s15, 1  ;;  %p49_p7 = scmp.eq.s32.totalorder %s46_s20, 0 }
   0xf   : > { %p774_p8 = por %p65_p5, %p64_p3  ;;  %p126_p10 = scmp.eq.s32.totalorder %s447_s16, 1 }
  0x10   : > { %p778_p9 = por %p120_p6, %p58_p1  ;;  %p497_p13 = scmp.lt.s32.totalorder %s702_s14, 2 }
  0x11   : > { %s954_s21 = scalar_select %p774_p8, 1, 0 }
  0x12   : > { %s955_s22 = scalar_select %p778_p9, 1, 0 }
  0x13   : > { %s783_s23 = scalar_select %p49_p7, %s690_s11, %s51_s18  }
  0x14   : > { %p785_p11 = por %p126_p10, %p64_p3  ;;  %s792_s25 = sand.u32 1, %s690_s11  }
  0x15   : > { %s450_s26 = sshll.u32 %s792_s25, 4  ;;  %s477_s27 = sshll.u32 %s698_s13, 8 }
  0x16   : > { %s956_s24 = scalar_select %p785_p11, 1, 0 }
  0x17   : > { %s799_s30 = scalar_lea.hbm %s948_s0, %s477_s27  ;;  %s150_s3 = scalar_lea.vmem [#allocation2], %s450_s26 }
  0x18   : > { %s159_s4 = sshll.u32 %s150_s3, 4  ;;  %p805_p0 = pnand %p497_p13, %p768_p4  ;;  %s801_s4 = int_to_ptr.vmem [resolvable:$true] %s159_s4 }
  0x19   : > { %s147_s6 = scalar_lea.sflag [#allocation3], %s792_s25  ;;  %s556_s7 = scalar_lea.hbm %s799_s30, 256 }
  0x1a   : > { %p557_p2 = scmp.ne.s32.totalorder %s799_s30, %s556_s7  ;;  %p558_p3 = pneg %p805_p0 }
  0x1b   : > { %s561_s16 = scalar_lea.hbm %s948_s0, 512  ;;  %p562_p4 = scmp.lt.u32.totalorder %s799_s30, %s948_s0 }
  0x1c   : > { %p559_p5 = pnand %p558_p3, %p557_p2  ;;  %p563_p7 = scmp.lt.u32.totalorder %s561_s16, %s556_s7 }
  0x1d   : > { %p565_p13 = scmp.lt.u32.totalorder %s556_s7, %s799_s30 }
  0x1e   : > { %p560_p6 = pneg %p559_p5  ;;  %p564_p10 = por %p563_p7, %p562_p4 }
  0x20   : > { %p566_p12 = por %p565_p13, %p564_p10 }
  0x22   : > { %p567_p1 = pnand %p566_p12, %p560_p6 }
  0x24   : > { %570 = shalt.err (!%p567_p1)
}
  0x25   : > { %s571_s20 = scalar_lea.vmem %s801_s4, 256  ;;  %s704_s26 = smov [#allocation2]  }
  0x26   : > { %p572_p2 = scmp.ne.s32.totalorder %s801_s4, %s571_s20  ;;  %s576_s27 = sshll.u32 %s704_s26, 4  ;;  %s577_s27 = int_to_ptr.vmem [resolvable:$false] %s576_s27 }
  0x27   : > { %s578_s28 = scalar_lea.vmem %s577_s27, 512  ;;  %p579_p9 = scmp.lt.s32.totalorder %s801_s4, %s577_s27 }
  0x28   : > { %p574_p5 = pnand %p572_p2, %p558_p3  ;;  %p580_p4 = scmp.lt.s32.totalorder %s578_s28, %s571_s20 }
  0x2a   : > { %p575_p11 = pneg %p574_p5  ;;  %p581_p7 = por %p580_p4, %p579_p9 }
  0x2c   : > { %p582_p10 = pnand %p581_p7, %p575_p11 }
  0x2e   : > { %585 = shalt.err (!%p582_p10)
}
  0x2f   : > { %s705_s29 = smov 128   ;;  %s706_s3 = smov 8  }
  0x30   : > { %489 = dma.hbm_to_vmem [thread:$0]  (!%p805_p0), %s799_s30, 256, %s801_s4, %s147_s6, %s705_s29, %s705_s29, %s706_s3  }
  0x31   : > { %p187_p12 = scmp.lt.s32.totalorder %s702_s14, 3  ;;  %s453_s7 = sshll.u32 %s792_s25, 3 }
  0x32   : > { %s454_s8 = sshll.u32 %s698_s13, 7  ;;  %p958_p9 = scmp.ge.s32.totalorder %s702_s14, 1 }
  0x33   : > { %s850_s19 = scalar_lea.hbm %s949_s1, %s454_s8  ;;  %s173_s20 = scalar_lea.vmem [#allocation5], %s453_s7 }
  0x34   : > { %p843_p11 = pnand %p958_p9, %p187_p12  ;;  %s182_s26 = sshll.u32 %s173_s20, 4  ;;  %s183_s26 = int_to_ptr.vmem [resolvable:$true] %s182_s26 }
  0x35   : > { %s170_s30 = scalar_lea.sflag [#allocation6], %s792_s25  ;;  %s586_s4 = scalar_lea.hbm %s850_s19, 128 }
  0x36   : > { %s959_s15 = scalar_select %p843_p11, 1, 0 }
  0x37   : > { %p587_p1 = scmp.ne.s32.totalorder %s850_s19, %s586_s4  ;;  %s591_s28 = scalar_lea.hbm %s949_s1, 256 }
  0x38   : > { %p592_p2 = scmp.lt.u32.totalorder %s850_s19, %s949_s1  ;;  %p593_p5 = scmp.lt.u32.totalorder %s591_s28, %s586_s4 }
  0x39   : > { %p589_p6 = pnand %p587_p1, %p558_p3  ;;  %p595_p7 = scmp.lt.u32.totalorder %s586_s4, %s850_s19 }
  0x3a   : > { %p594_p4 = por %p593_p5, %p592_p2 }
  0x3b   : > { %p590_p13 = pneg %p589_p6 }
  0x3c   : > { %p596_p10 = por %p595_p7, %p594_p4 }
  0x3e   : > { %p597_p12 = pnand %p596_p10, %p590_p13 }
  0x40   : > { %600 = shalt.err (!%p597_p12)
}
  0x41   : > { %s601_s25 = scalar_lea.vmem %s183_s26, 128  ;;  %s707_s7 = smov [#allocation5]  }
  0x42   : > { %p602_p9 = scmp.ne.s32.totalorder %s183_s26, %s601_s25  ;;  %s606_s8 = sshll.u32 %s707_s7, 4  ;;  %s607_s8 = int_to_ptr.vmem [resolvable:$false] %s606_s8 }
  0x43   : > { %s608_s16 = scalar_lea.vmem %s607_s8, 256  ;;  %p609_p8 = scmp.lt.s32.totalorder %s183_s26, %s607_s8 }
  0x44   : > { %p604_p1 = pnand %p602_p9, %p558_p3  ;;  %p610_p11 = scmp.lt.s32.totalorder %s608_s16, %s601_s25 }
  0x46   : > { %p605_p6 = pneg %p604_p1  ;;  %p611_p2 = por %p610_p11, %p609_p8 }
  0x48   : > { %p612_p5 = pnand %p611_p2, %p605_p6 }
  0x4a   : > { %615 = shalt.err (!%p612_p5)
}
  0x4b   : > { %492 = dma.hbm_to_vmem [thread:$0]  (!%p805_p0), %s850_s19, 128, %s183_s26, %s170_s30  }
  0x4c   : > { %p960_p13 = scmp.ne.s32.totalorder %s959_s15, 0 }
  0x4d   : > { %s875_s18 = sand.u32 (!%p960_p13), 1, %s686_s10   ;;  %p961_p3 = scmp.ne.s32.totalorder (!%p960_p13), %s954_s21, 0 }
  0x4e   : > { %191 = sbr.rel (%p960_p13) target bundleno = 146 (0x92), region = 28  ;;  %s456_s20 = sshll.u32 (!%p960_p13), %s875_s18, 4 }
  0x4f   : > { %s194_s4 = scalar_lea.sflag (!%p960_p13), [#allocation3], %s875_s18  ;;  %s197_s6 = scalar_lea.vmem (!%p960_p13), [#allocation2], %s456_s20 }
  0x55   : > { %669 = dma.done.wait (%p961_p3), %s194_s4, 256  }
  0x56   : > { %671 = vsyncadd (%p961_p3), %s194_s4, 4294967040  ;;  %s457_s5 = sshll.u32 %s875_s18, 3  ;;  %s203_s15 = scalar_lea.sflag [#allocation6], %s875_s18 }
  0x57   : > { %s206_s19 = scalar_lea.vmem [#allocation5], %s457_s5 }
  0x58   : > { %673 = dma.done.wait (%p961_p3), %s203_s15, 128  }
  0x59   : > { %675 = vsyncadd (%p961_p3), %s203_s15, 4294967168  ;;  %v241_v0 = vlaneseq  ;;  %s478_s26 = smul.u32 40, %s875_s18  ;;  %v234_v5 = vld [vmem:[%s197_s6] sm:$0xff]  ;;  %v458_v6 = vld [vmem:[%s197_s6 + $0x8] sm:$0xff]  ;;  %v708_v9 = vmov 0.0   ;;  %s316_s25 = scalar_lea.sflag [#allocation4], %s875_s18 }
  0x5a   : > { %v237_v7 = vld [vmem:[%s206_s19] sm:$0xff]  ;;  %v238_v8 = vsub.f32 %v458_v6, %v234_v5  ;;  %s479_s30 = smul.u32 640, %s694_s12  ;;  %p962_p0 = scmp.ne.s32.totalorder %s955_s22, 0 }
  0x5b   : > { %v242_v1 = vshrl.u32 %v241_v0, 7  ;;  %v244_v2 = vand.u32 127, %v241_v0  ;;  %vm240_vm0 = vcmp.eq.s32.totalorder %v237_v7, 1  ;;  %s231_s21 = scalar_lea.vmem [#allocation7], %s478_s26  ;;  %s709_s12 = smov [#allocation7]  }
  0x5c   : > { %vm239_vm3 = vcmp.gt.f32.partialorder %v238_v8, 0.0  ;;  %v255_v11 = vand.u32 2147483647, %v238_v8  ;;  %v264_v18 = vmax.f32 %v238_v8, 0.0  ;;  %s331_s27 = sshll.u32 %s231_s21, 4  ;;  %s899_s3 = scalar_lea.hbm %s950_s2, %s479_s30  ;;  %s894_s27 = int_to_ptr.vmem [resolvable:$true] %s331_s27 }
  0x5d   : > { %v247_v3 = vmul.u32 128, %v242_v1  ;;  %s616_s7 = scalar_lea.vmem %s894_s27, 640  ;;  %s620_s8 = sshll.u32 %s709_s12, 4  ;;  %s621_s8 = int_to_ptr.vmem [resolvable:$false] %s620_s8 }
  0x5e   : > { %v256_v13 = vsub.f32 0.0, %v255_v11  ;;  %p617_p8 = scmp.ne.s32.totalorder %s894_s27, %s616_s7  ;;  %s622_s16 = scalar_lea.vmem %s621_s8, 1280 }
  0x5f   : > { %v250_v4 = vadd.s32 %v247_v3, %v244_v2  ;;  %p623_p7 = scmp.lt.s32.totalorder %s894_s27, %s621_s8  ;;  %p624_p10 = scmp.lt.s32.totalorder %s622_s16, %s616_s7 }
  0x60   : > { %v257_v15 = vmul.f32 1.442695, %v256_v13  ;;  %p618_p11 = pnand %p617_p8, %p962_p0 }
  0x61   : > { %vm251_vm1 = vcmp.lt.s32.totalorder %v250_v4, 256  ;;  %p625_p12 = por %p624_p10, %p623_p7 }
  0x62   : > { %vm253_vm2 = vmand %vm251_vm1, %vm240_vm0  ;;  %552 = vpow2.f32 %v257_v15  ;;  %p619_p4 = pneg %p618_p11 }
  0x63   : > { %v459_v10 = vsel %vm253_vm2, 1.0, %v708_v9  ;;  %vm252_vm4 = vmand %vm251_vm1, %vm239_vm3 }
  0x64   : > { %463 = vst [vmem:[%s231_s21 + $0x10] sm:$0xff] %v459_v10  ;;  %vm254_vm5 = vmand %vm253_vm2, %vm252_vm4  ;;  %v461_v12 = vsel %vm252_vm4, 1.0, %v708_v9  ;;  %v266_v20 = vmul.f32 %v459_v10, %v238_v8  ;;  %p626_p9 = pnand %p625_p12, %p619_p4 }
  0x65   : > { %v460_v14 = vsel %vm254_vm5, 1.0, %v708_v9  ;;  %462 = vst [vmem:[%s231_s21 + $0x8] sm:$0xff] %v461_v12 }
  0x66   : > { %283 = vst [vmem:[%s231_s21] sm:$0xff] %v460_v14 }
  0x6c   : > { %v553_v16 = vpop.eup %552 }
  0x6d   : > { %v259_v17 = vadd.f32 1.0, %v553_v16 }
  0x6f   : > { %554 = vlog2.f32 %v259_v17 }
  0x79   : > { %v555_v19 = vpop.eup %554 }
  0x7a   : > { %v261_v21 = vmul.f32 0.6931472, %v555_v19 }
  0x7c   : > { %v265_v22 = vadd.f32 %v264_v18, %v261_v21 }
  0x7e   : > { %v267_v23 = vsub.f32 %v265_v22, %v266_v20 }
  0x80   : > { %v268_v24 = vsel %vm251_vm1, %v267_v23, 0.0 }
  0x81   : > { %v269_v25 = vmul.f32 %v459_v10, %v268_v24  ;;  %464 = vst [vmem:[%s231_s21 + $0x18] sm:$0xff] %v268_v24 }
  0x83   : > { %465 = vst [vmem:[%s231_s21 + $0x20] sm:$0xff] %v269_v25 }
  0x84   : > { %629 = shalt.err (!%p626_p9)
}
  0x85   : > { %s630_s20 = scalar_lea.hbm %s899_s3, 640  ;;  %s634_s5 = scalar_lea.hbm %s950_s2, 1280 }
  0x86   : > { %p631_p1 = scmp.ne.s32.totalorder %s899_s3, %s630_s20  ;;  %p635_p5 = scmp.lt.u32.totalorder %s899_s3, %s950_s2 }
  0x87   : > { %p636_p13 = scmp.lt.u32.totalorder %s634_s5, %s630_s20  ;;  %p638_p8 = scmp.lt.u32.totalorder %s630_s20, %s899_s3 }
  0x88   : > { %p632_p6 = pnand %p631_p1, %p962_p0 }
  0x89   : > { %p637_p3 = por %p636_p13, %p635_p5 }
  0x8a   : > { %p633_p2 = pneg %p632_p6 }
  0x8b   : > { %p639_p11 = por %p638_p8, %p637_p3 }
  0x8d   : > { %p640_p4 = pnand %p639_p11, %p633_p2 }
  0x8f   : > { %643 = shalt.err (!%p640_p4)
}
  0x90   : > { %s710_s26 = smov 128   ;;  %s711_s21 = smov 8  }
  0x91   : > { %484 = dma.vmem_to_hbm [thread:$0]  (%p962_p0), %s894_s27, 640, %s899_s3, %s316_s25, %s710_s26, %s710_s26, %s711_s21  }
  0x92 PF: > { %s346_s30 = sand.u32 1, %s682_s9   ;;  %p963_p7 = scmp.ne.s32.totalorder %s956_s24, 0 }
  0x93   : > { %p964_p10 = scmp.ge.s32.totalorder %s702_s14, 2  ;;  %s347_s28 = scalar_lea.sflag [#allocation4], %s346_s30 }
  0x95   : > { %p494_p12 = pnand %p964_p10, %p963_p7 }
  0x97   : > { %677 = dma.done.wait (!%p494_p12), %s347_s28, 640  }
  0x98   : > { %679 = vsyncadd (!%p494_p12), %s347_s28, 4294966656  ;;  %s21_s14 = sadd.s32 1, %s702_s14   ;;  %s965_s9 = smov %s686_s10 }
  0x99   : > { %p18_p9 = scmp.ge.s32.totalorder %s21_s14, 4   ;;  %s966_s10 = smov %s690_s11 }
  0x9a   : > { %s967_s11 = smov %s783_s23  ;;  %s968_s12 = smov %s698_s13 }
  0x9b   : > { %s969_s13 = smov %s971_s17  ;;  %20 = sbr.rel (!%p18_p9) target bundleno = 8 (0x8), region = 103 }
  0xa2   :  { %352 = vsyncpa [#allocation3], 1 }
  0xa3   :  { %354 = vsyncpa [#allocation3 + $0x1], 1 }
  0xa4   :  { %355 = vsyncpa [#allocation6], 1 }
  0xa5   :  { %357 = vsyncpa [#allocation6 + $0x1], 1 }
  0xa6   :  { %358 = vsyncpa [#allocation4], 1 }
  0xa7   :  { %360 = vsyncpa [#allocation4 + $0x1], 1 }

</bundles_post_ra>
